<compile_context>
chip_gen: v5e
topology: v5e:2x2
jax: 0.10.0
libtpu: 0.0.40
codegen_flags: <defaults>
</compile_context>

<pallas_src>
import functools

import jax
import jax.numpy as jnp
from jax import lax
from jax.experimental import pallas as pl
from jax.experimental.pallas import tpu as pltpu


def _poisson_encode_kernel(seed_ref, img_ref, out_ref, *, n_total):
    # seed_ref: SMEM int32[1]
    # img_ref : VMEM [1, bn]   (intensity tile, values nominally in [0, 1])
    # out_ref : VMEM [T, bn]   (spike tile)
    tt, bn = out_ref.shape
    col_off = pl.program_id(0) * bn

    # Integer threshold, computed once per tile (amortized over the T rows).
    # P(spike) = (floor(img*2^24)+1)/2^24  (clamped so img>=1 always fires, img<0 never).
    img = img_ref[...].astype(jnp.float32)                              # [1, bn]
    thr = jnp.minimum(img * 16777216.0, 16777215.0).astype(jnp.int32)   # [1, bn]

    # Global element index -> counter-based hash -> 24-bit uniform integer.
    rows = lax.broadcasted_iota(jnp.int32, (tt, bn), 0)
    cols = lax.broadcasted_iota(jnp.int32, (tt, bn), 1) + col_off
    idx = rows.astype(jnp.uint32) * jnp.uint32(n_total) + cols.astype(jnp.uint32)

    # lowbias32 finalizer (pure VPU int ops: xor/shift/mul).  On hardware this could be
    # swapped for pltpu.prng_random_bits, but that primitive has no interpret/CPU lowering.
    x = idx + seed_ref[0].astype(jnp.uint32) * jnp.uint32(0x9E3779B9)
    x = x ^ (x >> jnp.uint32(16))
    x = x * jnp.uint32(0x7FEB352D)
    x = x ^ (x >> jnp.uint32(15))
    x = x * jnp.uint32(0x846CA68B)
    x = x ^ (x >> jnp.uint32(16))

    bits24 = (x >> jnp.uint32(8)).astype(jnp.int32)            # uniform in [0, 2^24)
    out_ref[...] = (bits24 <= thr).astype(out_ref.dtype)       # [1,bn] broadcasts to [tt,bn]


def poisson_encoder_2d(img, T=4, seed=0, block_n=None):
    """img: [C, H, W] with values in [0, 1].  Returns [T, C, H, W] spikes in img's dtype."""
    C, H, W = img.shape
    dtype = img.dtype
    N = C * H * W

    # Flatten to a lane-dense [1, N] row; pad the lane axis to a multiple of 128.
    n_pad = -(-N // 128) * 128
    img_flat = img.reshape(1, N)
    if n_pad != N:
        img_flat = jnp.pad(img_flat, ((0, 0), (0, n_pad - N)))

    if block_n is None:
        # ~1 MiB output tile; x2 double-buffering stays well below the scoped-VMEM
        # defaults on every generation (v5e 16 MiB ... v7x 32 MiB of 64 MiB physical).
        elems = (1 << 20) // (jnp.dtype(dtype).itemsize * max(T, 1))
        block_n = max(128, (elems // 128) * 128)
    block_n = max(128, min((block_n // 128) * 128, n_pad))
    while n_pad % block_n != 0:          # block must evenly divide the padded lane axis
        block_n -= 128

    grid = (n_pad // block_n,)
    seed_arr = jnp.asarray([seed], dtype=jnp.int32)
    kernel = functools.partial(_poisson_encode_kernel, n_total=n_pad)

    out = pl.pallas_call(
        kernel,
        out_shape=jax.ShapeDtypeStruct((T, n_pad), dtype),
        grid=grid,
        in_specs=[
            pl.BlockSpec(memory_space=pltpu.MemorySpace.SMEM),      # seed scalar
            pl.BlockSpec((1, block_n), lambda j: (0, j)),           # image tile
        ],
        out_specs=pl.BlockSpec((T, block_n), lambda j: (0, j)),     # spike tile
        compiler_params=pltpu.CompilerParams(
            dimension_semantics=("parallel",),                      # independent tiles (v7x 2 TCs)
        ),
    )(seed_arr, img_flat)

    if n_pad != N:
        out = out[:, :N]
    return out.reshape(T, C, H, W)


if __name__ == "__main__":
    key = jax.random.PRNGKey(0)
    T = 4                      # matches PoissonEncoder2D(T=4) default
    C, H, W = 4, 16, 16        # small [C, H, W] image

    img = jax.random.uniform(key, (C, H, W), dtype=jnp.float32)

    spikes = poisson_encoder_2d(img, T=T, seed=0)
    spikes = jax.block_until_ready(spikes)

    # Semantics checks: shape [T, C, H, W], dtype matches input, values are binary,
    # and the overall spike rate tracks the mean intensity (4096 Bernoulli draws).
    assert spikes.shape == (T, C, H, W)
    assert spikes.dtype == img.dtype
    assert bool(jnp.all((spikes == 0.0) | (spikes == 1.0)))
    assert abs(float(spikes.mean()) - float(img.mean())) < 0.1

    print("KERNEL_OK")
</pallas_src>

<mosaic_0001>
module attributes {stable_mosaic.version = 11 : i64} {
  func.func @_poisson_encode_kernel(%arg0: i32, %arg1: memref<1xi32, #tpu.memory_space<smem>>, %arg2: memref<1x1024xf32, #tpu.memory_space<vmem>>, %arg3: memref<4x1024xf32, #tpu.memory_space<vmem>>) attributes {dimension_semantics = [#tpu.dimension_semantics<parallel>], iteration_bounds = array<i64: 1>, scalar_prefetch = 0 : i64, scratch_operands = 0 : i64, tpu.core_type = #tpu.core_type<tc>, window_params = [{transform_indices = @transform_0, window_bounds = array<i64: 1>}, {transform_indices = @transform_1, window_bounds = array<i64: 1, 1024>}, {transform_indices = @transform_2, window_bounds = array<i64: 4, 1024>}]} {
    %c1024_i32 = arith.constant 1024 : i32
    %0 = arith.muli %arg0, %c1024_i32 : i32
    %c0 = arith.constant 0 : index
    %c0_0 = arith.constant 0 : index
    %1 = vector.load %arg2[%c0, %c0_0] : memref<1x1024xf32, #tpu.memory_space<vmem>>, vector<1x1024xf32>
    %cst = arith.constant 0x4B800000 : f32
    %2 = vector.broadcast %cst : f32 to vector<1x1024xf32>
    %3 = arith.mulf %1, %2 : vector<1x1024xf32>
    %cst_1 = arith.constant 0x4B7FFFFF : f32
    %4 = vector.broadcast %cst_1 : f32 to vector<1x1024xf32>
    %5 = arith.minimumf %3, %4 : vector<1x1024xf32>
    %6 = arith.fptosi %5 : vector<1x1024xf32> to vector<1x1024xi32>
    %7 = tpu.iota {dimensions = array<i32: 0>} : vector<4x1024xi32>
    %8 = tpu.iota {dimensions = array<i32: 1>} : vector<4x1024xi32>
    %9 = vector.broadcast %0 : i32 to vector<4x1024xi32>
    %10 = arith.addi %8, %9 : vector<4x1024xi32>
    %c1024_i32_2 = arith.constant 1024 : i32
    %11 = vector.broadcast %c1024_i32_2 : i32 to vector<4x1024xi32>
    %12 = arith.muli %7, %11 : vector<4x1024xi32>
    %13 = arith.addi %12, %10 : vector<4x1024xi32>
    %c0_3 = arith.constant 0 : index
    %14 = memref.load %arg1[%c0_3] : memref<1xi32, #tpu.memory_space<smem>>
    %c-1640531527_i32 = arith.constant -1640531527 : i32
    %15 = arith.muli %14, %c-1640531527_i32 : i32
    %16 = vector.broadcast %15 : i32 to vector<4x1024xi32>
    %17 = arith.addi %13, %16 : vector<4x1024xi32>
    %c16_i32 = arith.constant 16 : i32
    %18 = vector.broadcast %c16_i32 : i32 to vector<4x1024xi32>
    %19 = arith.shrui %17, %18 : vector<4x1024xi32>
    %20 = arith.xori %17, %19 : vector<4x1024xi32>
    %c2146121005_i32 = arith.constant 2146121005 : i32
    %21 = vector.broadcast %c2146121005_i32 : i32 to vector<4x1024xi32>
    %22 = arith.muli %20, %21 : vector<4x1024xi32>
    %c15_i32 = arith.constant 15 : i32
    %23 = vector.broadcast %c15_i32 : i32 to vector<4x1024xi32>
    %24 = arith.shrui %22, %23 : vector<4x1024xi32>
    %25 = arith.xori %22, %24 : vector<4x1024xi32>
    %c-2073254261_i32 = arith.constant -2073254261 : i32
    %26 = vector.broadcast %c-2073254261_i32 : i32 to vector<4x1024xi32>
    %27 = arith.muli %25, %26 : vector<4x1024xi32>
    %c16_i32_4 = arith.constant 16 : i32
    %28 = vector.broadcast %c16_i32_4 : i32 to vector<4x1024xi32>
    %29 = arith.shrui %27, %28 : vector<4x1024xi32>
    %30 = arith.xori %27, %29 : vector<4x1024xi32>
    %c8_i32 = arith.constant 8 : i32
    %31 = vector.broadcast %c8_i32 : i32 to vector<4x1024xi32>
    %32 = arith.shrui %30, %31 : vector<4x1024xi32>
    %33 = vector.broadcast %6 : vector<1x1024xi32> to vector<4x1024xi32>
    %34 = arith.cmpi sle, %32, %33 : vector<4x1024xi32>
    %35 = arith.extui %34 : vector<4x1024xi1> to vector<4x1024xi32>
    %36 = arith.sitofp %35 : vector<4x1024xi32> to vector<4x1024xf32>
    %c0_5 = arith.constant 0 : index
    %c0_6 = arith.constant 0 : index
    %37 = vector.load %arg3[%c0_5, %c0_6] : memref<4x1024xf32, #tpu.memory_space<vmem>>, vector<4x1024xf32>
    tpu.vector_store %arg3[%c0_5, %c0_6], %36 {strides = array<i32>} : memref<4x1024xf32, #tpu.memory_space<vmem>>, vector<4x1024xf32>,
    return
  }
  func.func @transform_0(%arg0: i32) -> i32 {
    %c0_i32 = arith.constant 0 : i32
    %c0_i32_0 = arith.constant 0 : i32
    return %c0_i32 : i32
  }
  func.func @transform_1(%arg0: i32) -> (i32, i32) {
    %c0_i32 = arith.constant 0 : i32
    %c0_i32_0 = arith.constant 0 : i32
    return %c0_i32, %arg0 : i32, i32
  }
  func.func @transform_2(%arg0: i32) -> (i32, i32) {
    %c0_i32 = arith.constant 0 : i32
    %c0_i32_0 = arith.constant 0 : i32
    return %c0_i32, %arg0 : i32, i32
  }
}

</mosaic_0001>

<bundles_post_ra>
// kernel: tpu_custom_call.1
= control target key start
LH: loop header
LB: loop body
LE: loop exit
PB: predicated region body
PF: predicated region fallthrough
CT: control target
= control target key end

     0   :  { %8 = vsyncpa [#allocation4], 0  ;;  %s327_s0 = inlined_call_operand.<no memory space> [shape: s32[1], index: 0, kind: input, shape index: {}]   ;;  %s328_s1 = inlined_call_operand.hbm [shape: f32[1,1024], index: 1, kind: input, shape index: {}]   ;;  %s329_s2 = inlined_call_operand.hbm [shape: f32[4,1024], index: 2, kind: output, shape index: {}]  }
   0x1   :  { %9 = vsyncpa [#allocation5], 0  ;;  %s17_s11 = sshll.u32 %s328_s1, 4  ;;  %s286_s12 = smov [#allocation3]   ;;  %s18_s11 = int_to_ptr.hbm [resolvable:$true] %s17_s11 }
   0x2   :  { %s19_s13 = sshll.u32 %s286_s12, 4  ;;  %s20_s13 = int_to_ptr.vmem [resolvable:$true] %s19_s13 }
   0x3   :  { %22 = dma.hbm_to_vmem [thread:$0]  %s18_s11, 128, %s20_s13, [#allocation4]  }
   0x4   :  { %282 = dma.done.wait [#allocation4], 128  }
   0x5   :  { %283 = vsyncadd [#allocation4], 4294967168  ;;  %v32_v0 = vlaneseq  ;;  %s62_s16 = smul.u32 2654435769, %s327_s0  ;;  %v28_v16 = vld [vmem:[#allocation3] sm:$0xff]  ;;  %vm188_vm1 = vcmask 1043456  }
   0x6   :  { %v29_v21 = vmul.f32 16777216.0, %v28_v16  ;;  %s288_s0 = smov [#allocation6]   ;;  %s208_s19 = sshll.u32 %s329_s2, 4  ;;  %s209_s19 = int_to_ptr.hbm [resolvable:$true] %s208_s19 }
   0x7   :  { %v33_v1 = vshrl.u32 %v32_v0, 7  ;;  %v35_v2 = vand.u32 127, %v32_v0  ;;  %v63_v3 = vstv %s62_s16  ;;  %s206_s1 = sshll.u32 %s288_s0, 4  ;;  %s207_s1 = int_to_ptr.vmem [resolvable:$true] %s206_s1 }
   0x8   :  { %v30_v29 = vmin.f32 %v29_v21, 16777215.0 }
   0x9   :  { %v36_v4 = vadd.s32 128, %v35_v2  ;;  %v52_v5 = vmul.u32 1024, %v33_v1  ;;  %v37_v6 = vadd.s32 256, %v35_v2  ;;  %v38_v7 = vadd.s32 384, %v35_v2 }
   0xa   :  { %v39_v8 = vadd.s32 512, %v35_v2  ;;  %v40_v9 = vadd.s32 640, %v35_v2  ;;  %v41_v10 = vadd.s32 768, %v35_v2  ;;  %v42_v11 = vadd.s32 896, %v35_v2 }
   0xb   :  { %v53_v12 = vadd.s32 %v52_v5, %v35_v2  ;;  %v54_v13 = vadd.s32 %v52_v5, %v36_v4  ;;  %v55_v14 = vadd.s32 %v52_v5, %v37_v6  ;;  %v56_v15 = vadd.s32 %v52_v5, %v38_v7 }
   0xc   :  { %v57_v17 = vadd.s32 %v52_v5, %v39_v8  ;;  %v58_v18 = vadd.s32 %v52_v5, %v40_v9  ;;  %v59_v19 = vadd.s32 %v52_v5, %v41_v10  ;;  %v60_v20 = vadd.s32 %v52_v5, %v42_v11 }
   0xd   :  { %v64_v22 = vadd.s32 %v63_v3, %v53_v12  ;;  %v65_v23 = vadd.s32 %v63_v3, %v54_v13  ;;  %v66_v24 = vadd.s32 %v63_v3, %v55_v14  ;;  %v67_v25 = vadd.s32 %v63_v3, %v56_v15 }
   0xe   :  { %v68_v26 = vadd.s32 %v63_v3, %v57_v17  ;;  %v69_v27 = vadd.s32 %v63_v3, %v58_v18  ;;  %v70_v28 = vadd.s32 %v63_v3, %v59_v19  ;;  %v71_v36 = vadd.s32 %v63_v3, %v60_v20 }
   0xf   :  { %v72_v30 = vshrl.u32 %v64_v22, 16  ;;  %v73_v31 = vshrl.u32 %v65_v23, 16  ;;  %v74_v32 = vshrl.u32 %v66_v24, 16  ;;  %v75_v33 = vshrl.u32 %v67_v25, 16 }
  0x10   :  { %v76_v34 = vshrl.u32 %v68_v26, 16  ;;  %v77_v35 = vshrl.u32 %v69_v27, 16  ;;  %vm226_vm0 = vcmp.lt.s32.totalorder %v30_v29, 0  ;;  %v227_v37 = vceil.f32 %v30_v29 }
  0x11   :  { %v228_v38 = vfloor.f32 %v30_v29  ;;  %v80_v39 = vxor.u32 %v72_v30, %v64_v22  ;;  %v81_v40 = vxor.u32 %v73_v31, %v65_v23  ;;  %v82_v41 = vxor.u32 %v74_v32, %v66_v24 }
  0x12   :  { %v83_v42 = vxor.u32 %v75_v33, %v67_v25  ;;  %v84_v43 = vxor.u32 %v76_v34, %v68_v26  ;;  %v85_v46 = vxor.u32 %v77_v35, %v69_v27  ;;  %v78_v47 = vshrl.u32 %v70_v28, 16 }
  0x13   :  { %v229_v44 = vsel %vm226_vm0, %v227_v37, %v228_v38  ;;  %v88_v45 = vmul.u32 2146121005, %v80_v39  ;;  %v89_v49 = vmul.u32 2146121005, %v81_v40  ;;  %v90_v50 = vmul.u32 2146121005, %v82_v41 }
  0x14   :  { %v310_v48 = vcvt.f32.s32 %v229_v44  ;;  %v91_v51 = vmul.u32 2146121005, %v83_v42  ;;  %v92_v53 = vmul.u32 2146121005, %v84_v43  ;;  %v93_v54 = vmul.u32 2146121005, %v85_v46 }
  0x15   :  { %v96_v52 = vshrl.u32 %v88_v45, 15  ;;  %v79_v55 = vshrl.u32 %v71_v36, 16  ;;  %v97_v56 = vshrl.u32 %v89_v49, 15  ;;  %v98_v59 = vshrl.u32 %v90_v50, 15 }
  0x16   :  { %v144_v57 = vperm.slane %v310_v48, 0  ;;  %v145_v58 = vperm.slane %v310_v48, 1  ;;  %v99_v61 = vshrl.u32 %v91_v51, 15  ;;  %v146_v62 = vperm.slane %v310_v48, 2 }
  0x17   :  { %v104_v60 = vxor.u32 %v96_v52, %v88_v45  ;;  %v147_v63 = vperm.slane %v310_v48, 3  ;;  %v105_v0 = vxor.u32 %v97_v56, %v89_v49  ;;  %v106_v1 = vxor.u32 %v98_v59, %v90_v50 }
  0x18   :  { %v100_v2 = vshrl.u32 %v92_v53, 15  ;;  %v101_v3 = vshrl.u32 %v93_v54, 15  ;;  %v107_v5 = vxor.u32 %v99_v61, %v91_v51  ;;  %v148_v6 = vperm.slane %v310_v48, 4 }
  0x19   :  { %v112_v4 = vmul.u32 2221713035, %v104_v60  ;;  %v149_v7 = vperm.slane %v310_v48, 5  ;;  %v113_v8 = vmul.u32 2221713035, %v105_v0  ;;  %v86_v14 = vxor.u32 %v78_v47, %v70_v28 }
  0x1a   :  { %v114_v9 = vmul.u32 2221713035, %v106_v1  ;;  %v108_v10 = vxor.u32 %v100_v2, %v92_v53  ;;  %v109_v11 = vxor.u32 %v101_v3, %v93_v54  ;;  %v115_v13 = vmul.u32 2221713035, %v107_v5 }
  0x1b   :  { %v120_v12 = vshrl.u32 %v112_v4, 16  ;;  %v87_v15 = vxor.u32 %v79_v55, %v71_v36  ;;  %v121_v16 = vshrl.u32 %v113_v8, 16  ;;  %v94_v22 = vmul.u32 2146121005, %v86_v14 }
  0x1c   :  { %v122_v17 = vshrl.u32 %v114_v9, 16  ;;  %v116_v18 = vmul.u32 2221713035, %v108_v10  ;;  %v117_v19 = vmul.u32 2221713035, %v109_v11  ;;  %v123_v21 = vshrl.u32 %v115_v13, 16 }
  0x1d   :  { %v128_v20 = vxor.u32 %v120_v12, %v112_v4  ;;  %v95_v23 = vmul.u32 2146121005, %v87_v15  ;;  %v129_v24 = vxor.u32 %v121_v16, %v113_v8  ;;  %v102_v31 = vshrl.u32 %v94_v22, 15 }
  0x1e   :  { %v130_v25 = vxor.u32 %v122_v17, %v114_v9  ;;  %v124_v26 = vshrl.u32 %v116_v18, 16  ;;  %v125_v27 = vshrl.u32 %v117_v19, 16  ;;  %v131_v30 = vxor.u32 %v123_v21, %v115_v13 }
  0x1f   :  { %v136_v29 = vshrl.u32 %v128_v20, 8  ;;  %v103_v32 = vshrl.u32 %v95_v23, 15  ;;  %v137_v33 = vshrl.u32 %v129_v24, 8  ;;  %v110_v37 = vxor.u32 %v102_v31, %v94_v22 }
  0x20   :  { %v138_v34 = vshrl.u32 %v130_v25, 8  ;;  %v132_v28 = vxor.u32 %v124_v26, %v116_v18  ;;  %v133_v35 = vxor.u32 %v125_v27, %v117_v19  ;;  %v139_v36 = vshrl.u32 %v131_v30, 8 }
  0x21   :  { %vm152_vm2 = vcmp.le.s32.totalorder %v136_v29, %v144_v57  ;;  %v111_v38 = vxor.u32 %v103_v32, %v95_v23  ;;  %vm153_vm3 = vcmp.le.s32.totalorder %v137_v33, %v145_v58  ;;  %v287_v39 = vmov 0.0  }
  0x22   :  { %v218_v40 = vsel %vm152_vm2, 1.0, %v287_v39  ;;  %vm154_vm4 = vcmp.le.s32.totalorder %v138_v34, %v146_v62  ;;  %v140_v41 = vshrl.u32 %v132_v28, 8  ;;  %v219_v42 = vsel %vm153_vm3, 1.0, %v287_v39 }
  0x23   :  { %vm155_vm5 = vcmp.le.s32.totalorder %v139_v36, %v147_v63  ;;  %v220_v43 = vsel %vm154_vm4, 1.0, %v287_v39  ;;  %v141_v44 = vshrl.u32 %v133_v35, 8  ;;  %v184_v45 = vrot.slane %v219_v42, 4 }
  0x24   :  { %v221_v46 = vsel %vm155_vm5, 1.0, %v287_v39  ;;  %vm156_vm6 = vcmp.le.s32.totalorder %v140_v41, %v148_v6  ;;  %v118_v47 = vmul.u32 2221713035, %v110_v37  ;;  %v119_v50 = vmul.u32 2221713035, %v111_v38 }
  0x25   :  { %v185_v49 = vrot.slane %v221_v46, 4  ;;  %vm157_vm7 = vcmp.le.s32.totalorder %v141_v44, %v149_v7  ;;  %v189_v51 = vsel %vm188_vm1, %v218_v40, %v184_v45  ;;  %v222_v52 = vsel %vm156_vm6, 1.0, %v287_v39 }
  0x26   :  { %v223_v53 = vsel %vm157_vm7, 1.0, %v287_v39  ;;  %v126_v54 = vshrl.u32 %v118_v47, 16  ;;  %197 = vst [vmem:[#allocation6] sm:$0xff] %v189_v51  ;;  %v127_v57 = vshrl.u32 %v119_v50, 16  ;;  %v150_v59 = vperm.slane %v310_v48, 6 }
  0x27   :  { %v190_v55 = vsel %vm188_vm1, %v220_v43, %v185_v49  ;;  %v186_v56 = vrot.slane %v223_v53, 4  ;;  %v151_v62 = vperm.slane %v310_v48, 7 }
  0x28   :  { %198 = vst [vmem:[#allocation6 + $0x8] sm:$0xff] %v190_v55  ;;  %v134_v58 = vxor.u32 %v126_v54, %v118_v47  ;;  %v135_v61 = vxor.u32 %v127_v57, %v119_v50 }
  0x29   :  { %v191_v60 = vsel %vm188_vm1, %v222_v52, %v186_v56 }
  0x2a   :  { %199 = vst [vmem:[#allocation6 + $0x10] sm:$0xff] %v191_v60  ;;  %v142_v63 = vshrl.u32 %v134_v58, 8  ;;  %v143_v0 = vshrl.u32 %v135_v61, 8 }
  0x2c   :  { %vm158_vm8 = vcmp.le.s32.totalorder %v142_v63, %v150_v59  ;;  %vm159_vm9 = vcmp.le.s32.totalorder %v143_v0, %v151_v62 }
  0x2d   :  { %v224_v1 = vsel %vm158_vm8, 1.0, %v287_v39  ;;  %v225_v2 = vsel %vm159_vm9, 1.0, %v287_v39 }
  0x2e   :  { %v187_v3 = vrot.slane %v225_v2, 4 }
  0x30   :  { %v192_v4 = vsel %vm188_vm1, %v224_v1, %v187_v3 }
  0x31   :  { %200 = vst [vmem:[#allocation6 + $0x18] sm:$0xff] %v192_v4 }
  0x32   :  { %211 = dma.vmem_to_hbm [thread:$0]  %s207_s1, 512, %s209_s19, [#allocation5]  }
  0x33   :  { %284 = dma.done.wait [#allocation5], 512  }
  0x34   :  { %285 = vsyncadd [#allocation5], 4294966784 }
  0x35   :  { %216 = vsyncpa [#allocation4], 1 }
  0x36   :  { %217 = vsyncpa [#allocation5], 1 }

</bundles_post_ra>
